<compile_context>
chip_gen: v7x
topology: tpu7x:2x2x1
jax: 0.10.0
libtpu: 0.0.40
codegen_flags: <defaults>
</compile_context>

<pallas_src>
import functools

import numpy as np
import jax
import jax.numpy as jnp
from jax.experimental import pallas as pl
from jax.experimental.pallas import tpu as pltpu

EPS = 1e-5


# --------------------------------------------------------------------------
# Kernel 1: fused trunk.  Per (batch, N-tile) grid step:
#   conv1 (3->C1, VPU FMA, trans pre-folded) + shift + relu
#   conv2 (C1->C2, bf16 MXU)                 + shift + relu
#   conv3 (C2->Cout, bf16 MXU, Cout-chunked) -> masked running max into an
#   (8, Cout) VMEM accumulator; final cross-sublane reduce + hoisted
#   shift3/relu_last + store at the last N-tile.
# --------------------------------------------------------------------------
def _trunk_kernel(x_ref, w1_ref, sh1_ref, w2_ref, sh2_ref, w3_ref, sh3_ref,
                  out_ref, acc_ref, *, n_points, tn, relu_last, c_chunk):
    n = pl.program_id(1)
    n_last = pl.num_programs(1) - 1
    cout = w3_ref.shape[-1]

    @pl.when(n == 0)
    def _():
        acc_ref[...] = jnp.full(acc_ref.shape, -jnp.inf, dtype=jnp.float32)

    x = x_ref[0]                  # (TN, 3) f32
    w1 = w1_ref[0]                # (3, C1) f32 (BN scale + optional trans folded)

    # layer 1 (Cin=3): VPU broadcast-FMAs instead of a tiny-K MXU matmul.
    h = x[:, 0:1] * w1[0:1, :]
    for k in range(1, x.shape[1]):
        h = h + x[:, k:k + 1] * w1[k:k + 1, :]
    h = jnp.maximum(h + sh1_ref[...], 0.0)

    # layer 2: bf16 MXU matmul, f32 accumulation.
    h = jnp.dot(h.astype(jnp.bfloat16), w2_ref[...],
                preferred_element_type=jnp.float32)
    h = jnp.maximum(h + sh2_ref[...], 0.0)
    h2 = h.astype(jnp.bfloat16)   # (TN, C2) bf16, feeds the chunked conv3

    def _tile_max(t):
        # (TN, C) -> (8, C): VPU elementwise maxima; the single cross-sublane
        # (XLU) reduce happens once, in the finalize block.
        c = t.shape[-1]
        if tn % 8 == 0 and tn >= 8:
            return jnp.max(t.reshape(tn // 8, 8, c), axis=0)
        return jnp.broadcast_to(jnp.max(t, axis=0, keepdims=True), (8, c))

    def _update(valid):
        # conv3 chunked along Cout: the live f32 intermediate is (TN, c_chunk).
        # shift3 / relu_last are NOT applied here (hoisted past the max).
        for c0 in range(0, cout, c_chunk):
            cc = min(c_chunk, cout - c0)
            hc = jnp.dot(h2, w3_ref[:, c0:c0 + cc],
                         preferred_element_type=jnp.float32)
            if valid is not None:
                hc = jnp.where(valid, hc, -jnp.inf)
            part = _tile_max(hc)                              # (8, cc)
            acc_ref[:, c0:c0 + cc] = jnp.maximum(acc_ref[:, c0:c0 + cc], part)

    has_partial = (n_points % tn) != 0     # static trace-time check
    if not has_partial:
        _update(None)
    else:
        # Only the last tile can be partial: pay the compare/select there only.
        @pl.when(n < n_last)
        def _():
            _update(None)

        @pl.when(n == n_last)
        def _():
            row = jax.lax.broadcasted_iota(jnp.int32, (tn, 1), 0) + n * tn
            _update(row < n_points)

    @pl.when(n == n_last)
    def _():
        # Hoisted epilogue: max(relu(h + s)) == relu(max(h) + s) per channel.
        res = jnp.max(acc_ref[...], axis=0, keepdims=True) + sh3_ref[...]
        if relu_last:
            res = jnp.maximum(res, 0.0)
        out_ref[...] = res.reshape(1, 1, cout)


def fused_mlp_max(x_bnc, w1, sh1, w2, sh2, w3, sh3, *,
                  relu_last, per_batch_w1=False, tn=1024, c_chunk=256,
                  vmem_limit_bytes=32 * 1024 * 1024):
    """x_bnc: (B, N, 3); w1: (1|B, 3, C1) f32; w2/w3: bf16; sh*: (1, C) f32."""
    B, N, Cin = x_bnc.shape
    C1 = w1.shape[-1]
    C2 = w2.shape[-1]
    Cout = w3.shape[-1]

    TN = N if N <= tn else tn                   # TN==N (full) or tn (8-aligned)
    n_blocks = pl.cdiv(N, TN)
    cc = c_chunk if Cout % c_chunk == 0 else Cout

    kernel = functools.partial(_trunk_kernel, n_points=N, tn=TN,
                               relu_last=relu_last, c_chunk=cc)
    w1_idx = (lambda b, n: (b, 0, 0)) if per_batch_w1 else (lambda b, n: (0, 0, 0))

    in_specs = [
        pl.BlockSpec((1, TN, Cin), lambda b, n: (b, n, 0)),   # x tile
        pl.BlockSpec((1, Cin, C1), w1_idx),                   # conv1 weight
        pl.BlockSpec((1, C1), lambda b, n: (0, 0)),           # shift1
        pl.BlockSpec((C1, C2), lambda b, n: (0, 0)),          # conv2 weight
        pl.BlockSpec((1, C2), lambda b, n: (0, 0)),           # shift2
        pl.BlockSpec((C2, Cout), lambda b, n: (0, 0)),        # conv3 weight
        pl.BlockSpec((1, Cout), lambda b, n: (0, 0)),         # shift3
    ]

    out = pl.pallas_call(
        kernel,
        out_shape=jax.ShapeDtypeStruct((B, 1, Cout), jnp.float32),
        grid=(B, n_blocks),
        in_specs=in_specs,
        out_specs=pl.BlockSpec((1, 1, Cout), lambda b, n: (b, 0, 0)),
        scratch_shapes=[pltpu.VMEM((8, Cout), jnp.float32)],
        compiler_params=pltpu.CompilerParams(
            dimension_semantics=("parallel", "arbitrary"),
            vmem_limit_bytes=vmem_limit_bytes),
    )(x_bnc, w1, sh1, w2, sh2, w3, sh3)
    return out[:, 0, :]                                       # (B, Cout)


# --------------------------------------------------------------------------
# Kernel 2: fused STN head — fc(1024,512)+bn+relu -> fc(512,256)+bn+relu ->
# fc(256,9) (+eye folded into the shift).  Single pallas_call, whole batch,
# kept in f32 (tiny) so `trans` does not carry extra bf16 error.
# --------------------------------------------------------------------------
def _stn_head_kernel(g_ref, w1_ref, sh1_ref, w2_ref, sh2_ref, w3_ref, sh3_ref,
                     out_ref):
    h = jnp.dot(g_ref[...], w1_ref[...], preferred_element_type=jnp.float32)
    h = jnp.maximum(h + sh1_ref[...], 0.0)
    h = jnp.dot(h, w2_ref[...], preferred_element_type=jnp.float32)
    h = jnp.maximum(h + sh2_ref[...], 0.0)
    h = jnp.dot(h, w3_ref[...], preferred_element_type=jnp.float32)
    out_ref[...] = h + sh3_ref[...]


def stn_head(g, w1, sh1, w2, sh2, w3, sh3):
    B = g.shape[0]
    return pl.pallas_call(
        _stn_head_kernel,
        out_shape=jax.ShapeDtypeStruct((B, w3.shape[-1]), jnp.float32),
    )(g, w1, sh1, w2, sh2, w3, sh3)


# --------------------------------------------------------------------------
# Parameter construction (deterministic, synthetic).
# Conv1d(cin, cout, 1) weight stored as (cin, cout); conv bias + eval-mode
# BatchNorm folded: scale goes into the weight, shift stays as (1, cout).
# --------------------------------------------------------------------------
def make_conv_bn(key, cin, cout):
    kw, kb, kg, kbe, km, kv = jax.random.split(key, 6)
    w = jax.random.normal(kw, (cin, cout), jnp.float32) / np.sqrt(cin)
    b = jax.random.normal(kb, (cout,), jnp.float32) * 0.1
    gamma = jax.random.uniform(kg, (cout,), jnp.float32, 0.5, 1.5)
    beta = jax.random.normal(kbe, (cout,), jnp.float32) * 0.1
    mean = jax.random.normal(km, (cout,), jnp.float32) * 0.1
    var = jax.random.uniform(kv, (cout,), jnp.float32, 0.5, 1.5)
    scale = gamma / jnp.sqrt(var + EPS)
    w_folded = w * scale[None, :]                 # BN scale folded into weight
    shift = (beta + scale * (b - mean)).reshape(1, cout)
    return w_folded, shift


def make_linear(key, cin, cout):
    kw, kb = jax.random.split(key)
    w = jax.random.normal(kw, (cin, cout), jnp.float32) / np.sqrt(cin)
    b = jax.random.normal(kb, (cout,), jnp.float32) * 0.1
    return w, b.reshape(1, cout)


# --------------------------------------------------------------------------
# Full PointNetfeat forward (global_feat=True, feature_transform=False).
# --------------------------------------------------------------------------
def pointnetfeat_forward(x_bcn, params):
    """x_bcn: (B, 3, N) float32 — same NCL layout PyTorch would receive."""
    x_bnc = jnp.transpose(x_bcn, (0, 2, 1))                   # (B, N, 3)

    # ----- STN3d trunk -----
    (w1, s1), (w2, s2), (w3, s3) = params["stn_convs"]
    g = fused_mlp_max(x_bnc, w1[None], s1,
                      w2.astype(jnp.bfloat16), s2,
                      w3.astype(jnp.bfloat16), s3,
                      relu_last=True, per_batch_w1=False)     # (B, 1024)

    # ----- STN3d head (fused fc1/fc2/fc3 + eye), f32 -----
    f1w, f1s = params["stn_fc1"]
    f2w, f2s = params["stn_fc2"]
    f3w, f3s = params["stn_fc3"]
    eye = jnp.eye(3, dtype=jnp.float32).reshape(1, 9)
    t9 = stn_head(g, f1w, f1s, f2w, f2s, f3w, f3s + eye)       # (B, 9)
    trans = t9.reshape(-1, 3, 3)

    # ----- main trunk: bmm(x, trans) folded into conv1 weight -----
    (c1w, c1s), (c2w, c2s), (c3w, c3s) = params["feat_convs"]
    w1_eff = jnp.einsum("bij,jk->bik", trans, c1w)             # (B, 3, 64)
    global_feat = fused_mlp_max(x_bnc, w1_eff, c1s,
                                c2w.astype(jnp.bfloat16), c2s,
                                c3w.astype(jnp.bfloat16), c3s,
                                relu_last=False, per_batch_w1=True)  # (B, 1024)

    trans_feat = None                                          # feature_transform=False
    return global_feat, trans, trans_feat


# Pure-JAX f32 reference for correctness checking.
def reference_forward(x_bcn, params):
    x = jnp.transpose(x_bcn, (0, 2, 1))

    def mlp_max(h, convs, trans=None, relu_last=True):
        if trans is not None:
            h = jnp.einsum("bnc,bcd->bnd", h, trans)
        for i, (w, sh) in enumerate(convs):
            h = h @ w + sh
            if i < 2 or relu_last:
                h = jnp.maximum(h, 0.0)
        return jnp.max(h, axis=1)

    def dn(h, w, sh, relu):
        h = h @ w + sh
        return jnp.maximum(h, 0.0) if relu else h

    g = mlp_max(x, params["stn_convs"])
    f = dn(g, *params["stn_fc1"], True)
    f = dn(f, *params["stn_fc2"], True)
    t = dn(f, *params["stn_fc3"], False)
    trans = (t + jnp.eye(3, dtype=jnp.float32).reshape(1, 9)).reshape(-1, 3, 3)
    gf = mlp_max(x, params["feat_convs"], trans=trans, relu_last=False)
    return gf, trans


if __name__ == "__main__":
    key = jax.random.PRNGKey(0)
    keys = jax.random.split(key, 10)
    B, N = 2, 16                                               # small test shapes

    params = {
        "stn_convs": [make_conv_bn(keys[0], 3, 64),
                      make_conv_bn(keys[1], 64, 128),
                      make_conv_bn(keys[2], 128, 1024)],
        "stn_fc1": make_conv_bn(keys[3], 1024, 512),
        "stn_fc2": make_conv_bn(keys[4], 512, 256),
        "stn_fc3": make_linear(keys[5], 256, 9),
        "feat_convs": [make_conv_bn(keys[6], 3, 64),
                       make_conv_bn(keys[7], 64, 128),
                       make_conv_bn(keys[8], 128, 1024)],
    }

    x = jax.random.normal(keys[9], (B, 3, N), jnp.float32)     # PyTorch NCL input

    gf, trans, trans_feat = pointnetfeat_forward(x, params)
    jax.block_until_ready((gf, trans))

    gf_ref, trans_ref = reference_forward(x, params)
    # bf16 MXU inputs (f32 accumulation) in the trunks vs. pure-f32 reference.
    np.testing.assert_allclose(np.asarray(trans), np.asarray(trans_ref),
                               rtol=5e-2, atol=5e-2)
    np.testing.assert_allclose(np.asarray(gf), np.asarray(gf_ref),
                               rtol=5e-2, atol=5e-2)

    assert gf.shape == (B, 1024)
    assert trans.shape == (B, 3, 3)
    assert trans_feat is None
    print("KERNEL_OK")
</pallas_src>

<mosaic_0001>
module attributes {stable_mosaic.version = 11 : i64} {
  func.func @_trunk_kernel(%arg0: i32, %arg1: i32, %arg2: memref<1x16x3xf32, #tpu.memory_space<vmem>>, %arg3: memref<1x3x64xf32, #tpu.memory_space<vmem>>, %arg4: memref<1x64xf32, #tpu.memory_space<vmem>>, %arg5: memref<64x128xbf16, #tpu.memory_space<vmem>>, %arg6: memref<1x128xf32, #tpu.memory_space<vmem>>, %arg7: memref<128x1024xbf16, #tpu.memory_space<vmem>>, %arg8: memref<1x1024xf32, #tpu.memory_space<vmem>>, %arg9: memref<1x1x1024xf32, #tpu.memory_space<vmem>>, %arg10: memref<8x1024xf32, #tpu.memory_space<vmem>>) attributes {dimension_semantics = [#tpu.dimension_semantics<parallel>, #tpu.dimension_semantics<arbitrary>], iteration_bounds = array<i64: 2, 1>, scalar_prefetch = 0 : i64, scratch_operands = 1 : i64, tpu.core_type = #tpu.core_type<tc>, window_params = [{transform_indices = @transform_0, window_bounds = array<i64: 1, 16, 3>}, {pipeline_mode = #tpu.pipeline_mode<synchronous>, transform_indices = @transform_1, window_bounds = array<i64: 1, 3, 64>}, {pipeline_mode = #tpu.pipeline_mode<synchronous>, transform_indices = @transform_2, window_bounds = array<i64: 1, 64>}, {pipeline_mode = #tpu.pipeline_mode<synchronous>, transform_indices = @transform_3, window_bounds = array<i64: 64, 128>}, {pipeline_mode = #tpu.pipeline_mode<synchronous>, transform_indices = @transform_4, window_bounds = array<i64: 1, 128>}, {pipeline_mode = #tpu.pipeline_mode<synchronous>, transform_indices = @transform_5, window_bounds = array<i64: 128, 1024>}, {pipeline_mode = #tpu.pipeline_mode<synchronous>, transform_indices = @transform_6, window_bounds = array<i64: 1, 1024>}, {transform_indices = @transform_7, window_bounds = array<i64: 1, 1, 1024>}]} {
    %c0_i32 = arith.constant 0 : i32
    %0 = arith.cmpi eq, %arg1, %c0_i32 : i32
    %1 = arith.extui %0 : i1 to i32
    %c0_i32_0 = arith.constant 0 : i32
    %2 = arith.cmpi ne, %1, %c0_i32_0 : i32
    scf.if %2 {
      %cst_45 = arith.constant 0xFF800000 : f32
      %69 = vector.broadcast %cst_45 : f32 to vector<8x1024xf32>
      %c0_46 = arith.constant 0 : index
      %c0_47 = arith.constant 0 : index
      %70 = vector.load %arg10[%c0_46, %c0_47] : memref<8x1024xf32, #tpu.memory_space<vmem>>, vector<8x1024xf32>
      tpu.vector_store %arg10[%c0_46, %c0_47], %69 {strides = array<i32>} : memref<8x1024xf32, #tpu.memory_space<vmem>>, vector<8x1024xf32>,
    } else {
    }
    %c0 = arith.constant 0 : index
    %c0_1 = arith.constant 0 : index
    %c0_2 = arith.constant 0 : index
    %3 = vector.load %arg2[%c0, %c0_1, %c0_2] : memref<1x16x3xf32, #tpu.memory_space<vmem>>, vector<1x16x3xf32>
    %4 = vector.shape_cast %3 : vector<1x16x3xf32> to vector<16x3xf32>
    %c0_3 = arith.constant 0 : index
    %c0_4 = arith.constant 0 : index
    %c0_5 = arith.constant 0 : index
    %5 = vector.load %arg3[%c0_3, %c0_4, %c0_5] : memref<1x3x64xf32, #tpu.memory_space<vmem>>, vector<1x3x64xf32>
    %6 = vector.shape_cast %5 : vector<1x3x64xf32> to vector<3x64xf32>
    %7 = vector.extract_strided_slice %4 {offsets = [0, 0], sizes = [16, 1], strides = [1, 1]} : vector<16x3xf32> to vector<16x1xf32>
    %8 = vector.extract_strided_slice %6 {offsets = [0, 0], sizes = [1, 64], strides = [1, 1]} : vector<3x64xf32> to vector<1x64xf32>
    %9 = vector.broadcast %7 : vector<16x1xf32> to vector<16x64xf32>
    %10 = vector.broadcast %8 : vector<1x64xf32> to vector<16x64xf32>
    %11 = arith.mulf %9, %10 : vector<16x64xf32>
    %12 = vector.extract_strided_slice %4 {offsets = [0, 1], sizes = [16, 1], strides = [1, 1]} : vector<16x3xf32> to vector<16x1xf32>
    %13 = vector.extract_strided_slice %6 {offsets = [1, 0], sizes = [1, 64], strides = [1, 1]} : vector<3x64xf32> to vector<1x64xf32>
    %14 = vector.broadcast %12 : vector<16x1xf32> to vector<16x64xf32>
    %15 = vector.broadcast %13 : vector<1x64xf32> to vector<16x64xf32>
    %16 = arith.mulf %14, %15 : vector<16x64xf32>
    %17 = arith.addf %11, %16 : vector<16x64xf32>
    %18 = vector.extract_strided_slice %4 {offsets = [0, 2], sizes = [16, 1], strides = [1, 1]} : vector<16x3xf32> to vector<16x1xf32>
    %19 = vector.extract_strided_slice %6 {offsets = [2, 0], sizes = [1, 64], strides = [1, 1]} : vector<3x64xf32> to vector<1x64xf32>
    %20 = vector.broadcast %18 : vector<16x1xf32> to vector<16x64xf32>
    %21 = vector.broadcast %19 : vector<1x64xf32> to vector<16x64xf32>
    %22 = arith.mulf %20, %21 : vector<16x64xf32>
    %23 = arith.addf %17, %22 : vector<16x64xf32>
    %c0_6 = arith.constant 0 : index
    %c0_7 = arith.constant 0 : index
    %24 = vector.load %arg4[%c0_6, %c0_7] : memref<1x64xf32, #tpu.memory_space<vmem>>, vector<1x64xf32>
    %25 = vector.broadcast %24 : vector<1x64xf32> to vector<16x64xf32>
    %26 = arith.addf %23, %25 : vector<16x64xf32>
    %cst = arith.constant 0.000000e+00 : f32
    %27 = vector.broadcast %cst : f32 to vector<16x64xf32>
    %28 = arith.maximumf %26, %27 : vector<16x64xf32>
    %29 = arith.truncf %28 : vector<16x64xf32> to vector<16x64xbf16>
    %c0_8 = arith.constant 0 : index
    %c0_9 = arith.constant 0 : index
    %30 = vector.load %arg5[%c0_8, %c0_9] : memref<64x128xbf16, #tpu.memory_space<vmem>>, vector<64x128xbf16>
    %cst_10 = arith.constant dense<0.000000e+00> : vector<16x128xf32>
    %31 = tpu.matmul %29, %30, %cst_10 {dimension_numbers = #tpu.dot_dimension_numbers<[1], [0], [0], [1], [0, 0, 1, 1], [], []>} : vector<16x64xbf16>, vector<64x128xbf16>, vector<16x128xf32> -> vector<16x128xf32>
    %c0_11 = arith.constant 0 : index
    %c0_12 = arith.constant 0 : index
    %32 = vector.load %arg6[%c0_11, %c0_12] : memref<1x128xf32, #tpu.memory_space<vmem>>, vector<1x128xf32>
    %33 = vector.broadcast %32 : vector<1x128xf32> to vector<16x128xf32>
    %34 = arith.addf %31, %33 : vector<16x128xf32>
    %cst_13 = arith.constant 0.000000e+00 : f32
    %35 = vector.broadcast %cst_13 : f32 to vector<16x128xf32>
    %36 = arith.maximumf %34, %35 : vector<16x128xf32>
    %37 = arith.truncf %36 : vector<16x128xf32> to vector<16x128xbf16>
    %c0_14 = arith.constant 0 : index
    %c0_15 = arith.constant 0 : index
    %38 = vector.load %arg7[%c0_14, %c0_15] : memref<128x1024xbf16, #tpu.memory_space<vmem>>, vector<128x256xbf16>
    %cst_16 = arith.constant dense<0.000000e+00> : vector<16x256xf32>
    %39 = tpu.matmul %37, %38, %cst_16 {dimension_numbers = #tpu.dot_dimension_numbers<[1], [0], [0], [1], [0, 0, 1, 1], [], []>} : vector<16x128xbf16>, vector<128x256xbf16>, vector<16x256xf32> -> vector<16x256xf32>
    %40 = vector.shape_cast %39 : vector<16x256xf32> to vector<2x8x256xf32>
    %cst_17 = arith.constant dense<0xFF800000> : vector<8x256xf32>
    %41 = vector.multi_reduction <maximumf>, %40, %cst_17 [0] : vector<2x8x256xf32> to vector<8x256xf32>
    %c0_18 = arith.constant 0 : index
    %c0_19 = arith.constant 0 : index
    %42 = vector.load %arg10[%c0_18, %c0_19] : memref<8x1024xf32, #tpu.memory_space<vmem>>, vector<8x256xf32>
    %43 = arith.maximumf %42, %41 : vector<8x256xf32>
    %c0_20 = arith.constant 0 : index
    %c0_21 = arith.constant 0 : index
    %44 = vector.load %arg10[%c0_20, %c0_21] : memref<8x1024xf32, #tpu.memory_space<vmem>>, vector<8x256xf32>
    tpu.vector_store %arg10[%c0_20, %c0_21], %43 {strides = array<i32>} : memref<8x1024xf32, #tpu.memory_space<vmem>>, vector<8x256xf32>,
    %c0_22 = arith.constant 0 : index
    %c256 = arith.constant 256 : index
    %45 = vector.load %arg7[%c0_22, %c256] : memref<128x1024xbf16, #tpu.memory_space<vmem>>, vector<128x256xbf16>
    %cst_23 = arith.constant dense<0.000000e+00> : vector<16x256xf32>
    %46 = tpu.matmul %37, %45, %cst_23 {dimension_numbers = #tpu.dot_dimension_numbers<[1], [0], [0], [1], [0, 0, 1, 1], [], []>} : vector<16x128xbf16>, vector<128x256xbf16>, vector<16x256xf32> -> vector<16x256xf32>
    %47 = vector.shape_cast %46 : vector<16x256xf32> to vector<2x8x256xf32>
    %cst_24 = arith.constant dense<0xFF800000> : vector<8x256xf32>
    %48 = vector.multi_reduction <maximumf>, %47, %cst_24 [0] : vector<2x8x256xf32> to vector<8x256xf32>
    %c0_25 = arith.constant 0 : index
    %c256_26 = arith.constant 256 : index
    %49 = vector.load %arg10[%c0_25, %c256_26] : memref<8x1024xf32, #tpu.memory_space<vmem>>, vector<8x256xf32>
    %50 = arith.maximumf %49, %48 : vector<8x256xf32>
    %c0_27 = arith.constant 0 : index
    %c256_28 = arith.constant 256 : index
    %51 = vector.load %arg10[%c0_27, %c256_28] : memref<8x1024xf32, #tpu.memory_space<vmem>>, vector<8x256xf32>
    tpu.vector_store %arg10[%c0_27, %c256_28], %50 {strides = array<i32>} : memref<8x1024xf32, #tpu.memory_space<vmem>>, vector<8x256xf32>,
    %c0_29 = arith.constant 0 : index
    %c512 = arith.constant 512 : index
    %52 = vector.load %arg7[%c0_29, %c512] : memref<128x1024xbf16, #tpu.memory_space<vmem>>, vector<128x256xbf16>
    %cst_30 = arith.constant dense<0.000000e+00> : vector<16x256xf32>
    %53 = tpu.matmul %37, %52, %cst_30 {dimension_numbers = #tpu.dot_dimension_numbers<[1], [0], [0], [1], [0, 0, 1, 1], [], []>} : vector<16x128xbf16>, vector<128x256xbf16>, vector<16x256xf32> -> vector<16x256xf32>
    %54 = vector.shape_cast %53 : vector<16x256xf32> to vector<2x8x256xf32>
    %cst_31 = arith.constant dense<0xFF800000> : vector<8x256xf32>
    %55 = vector.multi_reduction <maximumf>, %54, %cst_31 [0] : vector<2x8x256xf32> to vector<8x256xf32>
    %c0_32 = arith.constant 0 : index
    %c512_33 = arith.constant 512 : index
    %56 = vector.load %arg10[%c0_32, %c512_33] : memref<8x1024xf32, #tpu.memory_space<vmem>>, vector<8x256xf32>
    %57 = arith.maximumf %56, %55 : vector<8x256xf32>
    %c0_34 = arith.constant 0 : index
    %c512_35 = arith.constant 512 : index
    %58 = vector.load %arg10[%c0_34, %c512_35] : memref<8x1024xf32, #tpu.memory_space<vmem>>, vector<8x256xf32>
    tpu.vector_store %arg10[%c0_34, %c512_35], %57 {strides = array<i32>} : memref<8x1024xf32, #tpu.memory_space<vmem>>, vector<8x256xf32>,
    %c0_36 = arith.constant 0 : index
    %c768 = arith.constant 768 : index
    %59 = vector.load %arg7[%c0_36, %c768] : memref<128x1024xbf16, #tpu.memory_space<vmem>>, vector<128x256xbf16>
    %cst_37 = arith.constant dense<0.000000e+00> : vector<16x256xf32>
    %60 = tpu.matmul %37, %59, %cst_37 {dimension_numbers = #tpu.dot_dimension_numbers<[1], [0], [0], [1], [0, 0, 1, 1], [], []>} : vector<16x128xbf16>, vector<128x256xbf16>, vector<16x256xf32> -> vector<16x256xf32>
    %61 = vector.shape_cast %60 : vector<16x256xf32> to vector<2x8x256xf32>
    %cst_38 = arith.constant dense<0xFF800000> : vector<8x256xf32>
    %62 = vector.multi_reduction <maximumf>, %61, %cst_38 [0] : vector<2x8x256xf32> to vector<8x256xf32>
    %c0_39 = arith.constant 0 : index
    %c768_40 = arith.constant 768 : index
    %63 = vector.load %arg10[%c0_39, %c768_40] : memref<8x1024xf32, #tpu.memory_space<vmem>>, vector<8x256xf32>
    %64 = arith.maximumf %63, %62 : vector<8x256xf32>
    %c0_41 = arith.constant 0 : index
    %c768_42 = arith.constant 768 : index
    %65 = vector.load %arg10[%c0_41, %c768_42] : memref<8x1024xf32, #tpu.memory_space<vmem>>, vector<8x256xf32>
    tpu.vector_store %arg10[%c0_41, %c768_42], %64 {strides = array<i32>} : memref<8x1024xf32, #tpu.memory_space<vmem>>, vector<8x256xf32>,
    %c0_i32_43 = arith.constant 0 : i32
    %66 = arith.cmpi eq, %arg1, %c0_i32_43 : i32
    %67 = arith.extui %66 : i1 to i32
    %c0_i32_44 = arith.constant 0 : i32
    %68 = arith.cmpi ne, %67, %c0_i32_44 : i32
    scf.if %68 {
      %c0_45 = arith.constant 0 : index
      %c0_46 = arith.constant 0 : index
      %69 = vector.load %arg10[%c0_45, %c0_46] : memref<8x1024xf32, #tpu.memory_space<vmem>>, vector<8x1024xf32>
      %cst_47 = arith.constant dense<0xFF800000> : vector<1024xf32>
      %70 = vector.multi_reduction <maximumf>, %69, %cst_47 [0] : vector<8x1024xf32> to vector<1024xf32>
      %71 = vector.shape_cast %70 : vector<1024xf32> to vector<1x1024xf32>
      %c0_48 = arith.constant 0 : index
      %c0_49 = arith.constant 0 : index
      %72 = vector.load %arg8[%c0_48, %c0_49] : memref<1x1024xf32, #tpu.memory_space<vmem>>, vector<1x1024xf32>
      %73 = arith.addf %71, %72 : vector<1x1024xf32>
      %cst_50 = arith.constant 0.000000e+00 : f32
      %74 = vector.broadcast %cst_50 : f32 to vector<1x1024xf32>
      %75 = arith.maximumf %73, %74 : vector<1x1024xf32>
      %76 = vector.shape_cast %75 : vector<1x1024xf32> to vector<1x1x1024xf32>
      %c0_51 = arith.constant 0 : index
      %c0_52 = arith.constant 0 : index
      %c0_53 = arith.constant 0 : index
      %77 = vector.load %arg9[%c0_51, %c0_52, %c0_53] : memref<1x1x1024xf32, #tpu.memory_space<vmem>>, vector<1x1x1024xf32>
      tpu.vector_store %arg9[%c0_51, %c0_52, %c0_53], %76 {strides = array<i32>} : memref<1x1x1024xf32, #tpu.memory_space<vmem>>, vector<1x1x1024xf32>,
    } else {
    }
    return
  }
  func.func @transform_0(%arg0: i32, %arg1: i32) -> (i32, i32, i32) {
    %c0_i32 = arith.constant 0 : i32
    %c0_i32_0 = arith.constant 0 : i32
    return %arg0, %arg1, %c0_i32 : i32, i32, i32
  }
  func.func @transform_1(%arg0: i32, %arg1: i32) -> (i32, i32, i32) {
    %c0_i32 = arith.constant 0 : i32
    %c0_i32_0 = arith.constant 0 : i32
    %c0_i32_1 = arith.constant 0 : i32
    %c0_i32_2 = arith.constant 0 : i32
    return %c0_i32, %c0_i32_0, %c0_i32_1 : i32, i32, i32
  }
  func.func @transform_2(%arg0: i32, %arg1: i32) -> (i32, i32) {
    %c0_i32 = arith.constant 0 : i32
    %c0_i32_0 = arith.constant 0 : i32
    %c0_i32_1 = arith.constant 0 : i32
    return %c0_i32, %c0_i32_0 : i32, i32
  }
  func.func @transform_3(%arg0: i32, %arg1: i32) -> (i32, i32) {
    %c0_i32 = arith.constant 0 : i32
    %c0_i32_0 = arith.constant 0 : i32
    %c0_i32_1 = arith.constant 0 : i32
    return %c0_i32, %c0_i32_0 : i32, i32
  }
  func.func @transform_4(%arg0: i32, %arg1: i32) -> (i32, i32) {
    %c0_i32 = arith.constant 0 : i32
    %c0_i32_0 = arith.constant 0 : i32
    %c0_i32_1 = arith.constant 0 : i32
    return %c0_i32, %c0_i32_0 : i32, i32
  }
  func.func @transform_5(%arg0: i32, %arg1: i32) -> (i32, i32) {
    %c0_i32 = arith.constant 0 : i32
    %c0_i32_0 = arith.constant 0 : i32
    %c0_i32_1 = arith.constant 0 : i32
    return %c0_i32, %c0_i32_0 : i32, i32
  }
  func.func @transform_6(%arg0: i32, %arg1: i32) -> (i32, i32) {
    %c0_i32 = arith.constant 0 : i32
    %c0_i32_0 = arith.constant 0 : i32
    %c0_i32_1 = arith.constant 0 : i32
    return %c0_i32, %c0_i32_0 : i32, i32
  }
  func.func @transform_7(%arg0: i32, %arg1: i32) -> (i32, i32, i32) {
    %c0_i32 = arith.constant 0 : i32
    %c0_i32_0 = arith.constant 0 : i32
    %c0_i32_1 = arith.constant 0 : i32
    return %arg0, %c0_i32, %c0_i32_0 : i32, i32, i32
  }
}

</mosaic_0001>

<bundles_post_ra>
// kernel: tpu_custom_call.1
= control target key start
LH: loop header
LB: loop body
LE: loop exit
PB: predicated region body
PF: predicated region fallthrough
CT: control target
= control target key end

     0   :  { %12 = vsyncpa [#allocation4], 0  ;;  %s1936_s0 = inlined_call_operand.vmem [shape: f32[2,16,3], index: 0, kind: input, shape index: {}]   ;;  %s1937_s1 = inlined_call_operand.vmem [shape: f32[1,3,64], index: 1, kind: input, shape index: {}]   ;;  %s1938_s2 = inlined_call_operand.vmem [shape: f32[1,64], index: 2, kind: input, shape index: {}]   ;;  %s1939_s3 = inlined_call_operand.vmem [shape: bf16[64,128], index: 3, kind: input, shape index: {}]   ;;  %s1940_s4 = inlined_call_operand.vmem [shape: f32[1,128], index: 4, kind: input, shape index: {}]   ;;  %s1941_s5 = inlined_call_operand.hbm [shape: bf16[128,1024], index: 5, kind: input, shape index: {}]   ;;  %s1942_s6 = inlined_call_operand.vmem [shape: f32[1,1024], index: 6, kind: input, shape index: {}]   ;;  %s1943_s7 = inlined_call_operand.hbm [shape: f32[2,1,1024], index: 7, kind: output, shape index: {}]  }
   0x1   :  { %13 = vsyncpa [#allocation5], 0 }
   0x2   :  { %15 = vsyncpa [#allocation5 + $0x1], 0  ;;  %s1696_s24 = smov 0   ;;  %s1698_s25 = smov 0  }
   0x3   :  { %s1700_s26 = smov 0   ;;  %s1702_s27 = smov 0  }
   0x4   :  { %s1704_s28 = smov 0   ;;  %s1706_s29 = smov 0  }
   0x5 LB: > { %s1347_s30 = sadd.s32 4294967295, %s1644_s29   ;;  %s1348_s8 = sadd.s32 4294967294, %s1644_s29   ;;  %s1644_s29 = sphi %s1706_s29, %s21_s29   ;;  %s1640_s28 = sphi %s1704_s28, %s1961_s28   ;;  %s1636_s27 = sphi %s1702_s27, %s1960_s27   ;;  %s1632_s26 = sphi %s1700_s26, %s1959_s26   ;;  %s1628_s25 = sphi %s1698_s25, %s1958_s25   ;;  %s1624_s24 = sphi %s1696_s24, %s1957_s24  }
   0x6   : > { %s33_s9 = sadd.s32 1, %s1640_s28  ;;  %s194_s10 = sadd.s32 1, %s1632_s26 }
   0x7   : > { %p35_p0 = scmp.ge.s32.totalorder %s33_s9, 2  ;;  %p204_p1 = scmp.ne.s32.totalorder %s1632_s26, %s1628_s25 }
   0x8   : > { %p205_p2 = scmp.eq.s32.totalorder %s1347_s30, 1  ;;  %p210_p3 = scmp.ne.s32.totalorder %s1628_s25, %s1624_s24 }
   0x9   : > { %s1963_s9 = smov (%p35_p0, %s33_s9), 0  ;;  %p211_p5 = scmp.eq.s32.totalorder %s1348_s8, 1 }
   0xa   : > { %p1736_p4 = por %p205_p2, %p204_p1  ;;  %s191_s12 = ssub.s32 %s1640_s28, %s1963_s9 }
   0xb   : > { %p1349_p6 = scmp.ge.s32.totalorder %s1644_s29, 1  ;;  %p192_p7 = scmp.eq.s32.totalorder %s191_s12, 0 }
   0xc   : > { %s1948_s11 = scalar_select %p1736_p4, 1, 0 }
   0xd   : > { %p1743_p8 = por %p211_p5, %p210_p3  ;;  %p218_p9 = scmp.lt.s32.totalorder %s1644_s29, 3 }
   0xe   : > { %s1749_s14 = scalar_select %p192_p7, %s1632_s26, %s194_s10  }
   0xf   : > { %s1949_s13 = scalar_select %p1743_p8, 1, 0 }
  0x10   : > { %p1751_p10 = pnand %p1349_p6, %p218_p9  ;;  %p1755_p11 = scmp.eq.s32.totalorder %s1347_s30, 0 }
  0x11   : > { %s1646_s17 = smov [#allocation3]   ;;  %s1534_s22 = scalar_lea.hbm %s1941_s5, 8192 }
  0x12   : > { %s1950_s15 = scalar_select %p1751_p10, 1, 0 }
  0x13   : > { %s1951_s16 = scalar_select %p1755_p11, 1, 0 }
  0x14   : > { %p1458_p12 = pneg %p1751_p10  ;;  %s242_s18 = sshll.u32 %s1646_s17, 4  ;;  %s243_s18 = int_to_ptr.vmem [resolvable:$true] %s242_s18 }
  0x15   : > { %p1535_p0 = scmp.ne.s32.totalorder %s1941_s5, %s1534_s22  ;;  %p1541_p5 = scmp.lt.u32.totalorder %s1534_s22, %s1941_s5 }
  0x16   : > { %p1763_p13 = pnand %p1755_p11, %p1458_p12 }
  0x18   : > { %p1536_p1 = pneg %p1763_p13 }
  0x1a   : > { %p1537_p2 = pnand %p1536_p1, %p1535_p0 }
  0x1c   : > { %p1538_p3 = pneg %p1537_p2 }
  0x1e   : > { %p1543_p6 = pnand %p1541_p5, %p1538_p3 }
  0x20   : > { %1546 = shalt.err (!%p1543_p6)
}
  0x21   : > { %s1547_s12 = scalar_lea.vmem %s243_s18, 8192  ;;  %p1555_p8 = scmp.lt.s32.totalorder %s243_s18, %s243_s18 }
  0x22   : > { %p1548_p7 = scmp.ne.s32.totalorder %s243_s18, %s1547_s12  ;;  %p1556_p4 = scmp.lt.s32.totalorder %s1547_s12, %s1547_s12 }
  0x24   : > { %p1550_p9 = pnand %p1548_p7, %p1536_p1  ;;  %p1557_p11 = por %p1556_p4, %p1555_p8 }
  0x26   : > { %p1551_p12 = pneg %p1550_p9 }
  0x28   : > { %p1558_p10 = pnand %p1557_p11, %p1551_p12 }
  0x2a   : > { %1561 = shalt.err (!%p1558_p10)
}
  0x2b   : > { %s1647_s17 = smov 512   ;;  %s1648_s20 = smov 32  }
  0x2c   : > { %1461 = dma.hbm_to_vmem [thread:$0]  (!%p1763_p13), %s1941_s5, 8192, %s243_s18, [#allocation4], %s1647_s17, %s1647_s17, %s1648_s20  }
  0x2d   : > { %p1953_p0 = scmp.ne.s32.totalorder %s1950_s15, 0 }
  0x2e   : > { %p1954_p2 = scmp.ne.s32.totalorder (!%p1953_p0), %s1951_s16, 0 }
  0x2f   : > { %274 = sbr.rel (%p1953_p0) target bundleno = 718 (0x2ce), region = 48 }
  0x36   : > { %1615 = dma.done.wait (%p1954_p2), [#allocation4], 8192  }
  0x37   : > { %1617 = vsyncadd (%p1954_p2), [#allocation4], 4294959104  ;;  %p311_p4 = scmp.lt.s32.totalorder %s1636_s27, 1  ;;  %v1649_v0 = vmov 1   ;;  %v1650_v1 = vmov 0   ;;  %v1530_v4 = vld [vmem:[%s1939_s3] sm:$0xff]   ;;  %v346_v38 = vlaneseq }
  0x38   : > { %1527 = vset.pattern.permute.xlu1 %v1649_v0  ;;  %1526 = vset.pattern.permute.xlu0 %v1650_v1  ;;  %v1651_v5 = vmov 0.0   ;;  %v1531_v6 = vld [vmem:[%s1939_s3 + $0x8] sm:$0xff]   ;;  %v1652_v7 = vmov 2   ;;  %v1532_v8 = vld [vmem:[%s1939_s3 + $0x10] sm:$0xff]   ;;  %v1533_v9 = vld [vmem:[%s1939_s3 + $0x18] sm:$0xff]   ;;  %vm1653_vm0 = vmmov 0  }
  0x39   : > { %s312_s19 = scalar_select %p311_p4, %s1636_s27, 1  ;;  %611 = vmatprep.mubr.bf16.mxu1 %v1650_v1  ;;  %1440 = vmatprep.subr.bf16.mxu0 %v1651_v5  ;;  %v483_v10 = vld [vmem:[#allocation3] sm:$0xff]  ;;  %v1808_v12 = vld [vmem:[#allocation3 + $0x8] sm:$0xff]  ;;  %v1816_v39 = vshrl.u32 %v346_v38, 7  ;;  %vm435_vm1 = vcmask 523264  }
  0x3a   : > { %1441 = vmatpush3.bf16.msra.mxu0 %v1530_v4  ;;  %1448 = vmatprep.mubr.msk.bf16.mxu0 %vm1653_vm0, %v1651_v5  ;;  %v484_v11 = vld [vmem:[#allocation3 + $0x20] sm:$0xff]  ;;  %v1810_v14 = vld [vmem:[#allocation3 + $0x28] sm:$0xff]  ;;  %s307_s12 = sand.u32 1, %s1628_s25   ;;  %s1434_s20 = sshll.u32 %s1636_s27, 7 }
  0x3b   : > { %s1433_s18 = sshll.u32 %s312_s19, 4  ;;  %1442 = vmatprep.subr.bf16.mxu0 %v1651_v5  ;;  %v1365_v13 = vcombine.high %v483_v10, %v484_v11  ;;  %v1364_v15 = vcombine.low %v483_v10, %v484_v11  ;;  %v485_v16 = vld [vmem:[#allocation3 + $0x40] sm:$0xff]  ;;  %v1380_v18 = vcombine.low %v1808_v12, %v1810_v14  ;;  %v1381_v19 = vcombine.high %v1808_v12, %v1810_v14  ;;  %v633_v4 = vld [vmem:[#allocation3 + $0x68] sm:$0xff]  ;;  %s1354_s17 = sshll.u32 %s307_s12, 3 }
  0x3c   : > { %s318_s30 = scalar_lea.vmem %s1936_s0, %s1433_s18  ;;  %v486_v17 = vld [vmem:[#allocation3 + $0x60] sm:$0xff]  ;;  %v362_v40 = vsub.s32 1, %v1816_v39  ;;  %v348_v41 = vsub.s32 0, %v1816_v39  ;;  %v378_v45 = vsub.s32 2, %v1816_v39  ;;  %v635_v10 = vld [vmem:[#allocation3 + $0xa8] sm:$0xff]  ;;  %s309_s21 = scalar_lea.vmem [#allocation6], %s1354_s17 }
  0x3d   : > { %v333_v2 = vld [vmem:[%s318_s30] sm:$0xff]  ;;  %v334_v3 = vld [vmem:[%s318_s30 + $0x8] sm:$0xff]  ;;  %v1367_v20 = vcombine.high %v485_v16, %v486_v17  ;;  %579 = vmatprep.subr.bf16.mxu1 %v1365_v13  ;;  %v1366_v21 = vcombine.low %v485_v16, %v486_v17  ;;  %s1262_s23 = sshll.u32 %s309_s21, 4  ;;  %s1889_s15 = scalar_lea.hbm %s1943_s7, %s1434_s20  ;;  %s1891_s23 = int_to_ptr.vmem [resolvable:$true] %s1262_s23 }
  0x3e   : > { %353 = vperm.xlu1 %1527, %v333_v2   ;;  %338 = vperm.xlu0 %1526, %v333_v2   ;;  %v487_v22 = vld [vmem:[#allocation3 + $0x80] sm:$0xff]  ;;  %v637_v16 = vld [vmem:[#allocation3 + $0xe8] sm:$0xff]  ;;  %s1248_s27 = scalar_lea.sflag [#allocation5], %s307_s12  ;;  %s1562_s22 = scalar_lea.vmem %s1891_s23, 128 }
  0x3f   : > { %1443 = vmatpush3.bf16.msra.mxu0 %v1531_v6  ;;  %580 = vmatpush1.bf16.msra.mxu1 %v1364_v15  ;;  %v488_v23 = vld [vmem:[#allocation3 + $0xa0] sm:$0xff]  ;;  %v636_v15 = vld [vmem:[#allocation3 + $0xc8] sm:$0xff]  ;;  %p1563_p8 = scmp.ne.s32.totalorder %s1891_s23, %s1562_s22  ;;  %p1955_p10 = scmp.ne.s32.totalorder %s1948_s11, 0 }
  0x40   : > { %1444 = vmatprep.subr.bf16.mxu0 %v1651_v5  ;;  %581 = vmatprep.subr.bf16.mxu1 %v1367_v20  ;;  %v1369_v24 = vcombine.high %v487_v22, %v488_v23  ;;  %v1368_v25 = vcombine.low %v487_v22, %v488_v23  ;;  %v489_v26 = vld [vmem:[#allocation3 + $0xc0] sm:$0xff]  ;;  %v638_v20 = vld [vmem:[#allocation3 + $0x108] sm:$0xff]  ;;  %v1386_v22 = vcombine.low %v636_v15, %v637_v16  ;;  %s1655_s30 = smov [#allocation6]  }
  0x41   : > { %v490_v27 = vld [vmem:[#allocation3 + $0xe0] sm:$0xff]  ;;  %v641_v12 = vld [vmem:[#allocation3 + $0x168] sm:$0xff]  ;;  %p1564_p11 = pnand %p1563_p8, %p1955_p10  ;;  %s1566_s16 = sshll.u32 %s1655_s30, 4  ;;  %s1567_s16 = int_to_ptr.vmem [resolvable:$false] %s1566_s16 }
  0x42   : > { %357 = vperm.xlu1 %1527, %v334_v3   ;;  %343 = vperm.xlu0 %1526, %v334_v3   ;;  %v1371_v28 = vcombine.high %v489_v26, %v490_v27  ;;  %v1370_v29 = vcombine.low %v489_v26, %v490_v27  ;;  %v491_v30 = vld [vmem:[#allocation3 + $0x100] sm:$0xff]  ;;  %v645_v38 = vld [vmem:[#allocation3 + $0x1e8] sm:$0xff]  ;;  %s1568_s8 = scalar_lea.vmem %s1567_s16, 256  ;;  %p1569_p1 = scmp.lt.s32.totalorder %s1891_s23, %s1567_s16 }
  0x43   : > { %1445 = vmatpush3.bf16.msra.mxu0 %v1532_v8  ;;  %582 = vmatpush1.bf16.msra.mxu1 %v1366_v21  ;;  %v492_v31 = vld [vmem:[#allocation3 + $0x120] sm:$0xff]  ;;  %v639_v21 = vld [vmem:[#allocation3 + $0x128] sm:$0xff]  ;;  %p1565_p13 = pneg %p1564_p11  ;;  %p1570_p3 = scmp.lt.s32.totalorder %s1568_s8, %s1562_s22 }
  0x44   : > { %1446 = vmatprep.subr.bf16.mxu0 %v1651_v5  ;;  %583 = vmatprep.subr.bf16.mxu1 %v1369_v24  ;;  %v1373_v32 = vcombine.high %v491_v30, %v492_v31  ;;  %v1372_v33 = vcombine.low %v491_v30, %v492_v31  ;;  %v493_v34 = vld [vmem:[#allocation3 + $0x140] sm:$0xff]  ;;  %v1389_v23 = vcombine.high %v638_v20, %v639_v21  ;;  %v640_v24 = vld [vmem:[#allocation3 + $0x148] sm:$0xff] }
  0x45   : > { %v494_v35 = vld [vmem:[#allocation3 + $0x160] sm:$0xff]  ;;  %v1388_v14 = vcombine.low %v638_v20, %v639_v21  ;;  %v643_v30 = vld [vmem:[#allocation3 + $0x1a8] sm:$0xff]  ;;  %v930_v20 = vld [vmem:[#allocation3 + $0xd8] sm:$0xff]  ;;  %p1571_p5 = por %p1570_p3, %p1569_p1 }
  0x46   : > { %1529 = vset.pattern.permute.xlu1 %v1652_v7  ;;  %1528 = vset.pattern.permute.xlu0 %v1652_v7  ;;  %v1375_v36 = vcombine.high %v493_v34, %v494_v35  ;;  %v1374_v37 = vcombine.low %v493_v34, %v494_v35  ;;  %v335_v42 = vld [vmem:[%s1937_s1] sm:$0x7]  ;;  %v931_v21 = vld [vmem:[#allocation3 + $0xf8] sm:$0xff] }
  0x47   : > { %373 = vperm.xlu1 %1529, %v334_v3   ;;  %369 = vperm.xlu0 %1528, %v333_v2   ;;  %v363_v46 = vrot.slane %v335_v42, %v362_v40  ;;  %v349_v47 = vrot.slane %v335_v42, %v348_v41  ;;  %v379_v50 = vrot.slane %v335_v42, %v378_v45  ;;  %v1357_v61 = vld [vmem:[%s1938_s2] ss:$0 sm:$0xff]  ;;  %v632_v3 = vld [vmem:[#allocation3 + $0x48] sm:$0xff]  ;;  %p1572_p6 = pnand %p1571_p5, %p1565_p13 }
  0x48   : > { %1447 = vmatpush3.bf16.msra.mxu0 %v1533_v9  ;;  %584 = vmatpush1.bf16.msra.mxu1 %v1368_v25  ;;  %v1383_v8 = vcombine.high %v632_v3, %v633_v4  ;;  %v634_v9 = vld [vmem:[#allocation3 + $0x88] sm:$0xff]  ;;  %v1382_v11 = vcombine.low %v632_v3, %v633_v4  ;;  %v1390_v25 = vcombine.low %v640_v24, %v641_v12  ;;  %v495_v26 = vld [vmem:[#allocation3 + $0x180] sm:$0xff] }
  0x49   : > { %726 = vmatprep.subr.bf16.mxu0 %v1381_v19  ;;  %585 = vmatprep.subr.bf16.mxu1 %v1371_v28  ;;  %v1385_v13 = vcombine.high %v634_v9, %v635_v10  ;;  %v1384_v17 = vcombine.low %v634_v9, %v635_v10  ;;  %v1387_v19 = vcombine.high %v636_v15, %v637_v16  ;;  %v496_v27 = vld [vmem:[#allocation3 + $0x1a0] sm:$0xff]  ;;  %v642_v28 = vld [vmem:[#allocation3 + $0x188] sm:$0xff]  ;;  %v928_v9 = vld [vmem:[#allocation3 + $0x98] sm:$0xff] }
  0x4a   : > { %v1392_v31 = vcombine.low %v642_v28, %v643_v30  ;;  %v497_v34 = vld [vmem:[#allocation3 + $0x1c0] sm:$0xff]  ;;  %v929_v10 = vld [vmem:[#allocation3 + $0xb8] sm:$0xff] }
  0x4b   : > { %v498_v35 = vld [vmem:[#allocation3 + $0x1e0] sm:$0xff]  ;;  %v1417_v16 = vcombine.high %v928_v9, %v929_v10 }
  0x4c   : > { %586 = vmatpush1.bf16.msra.mxu1 %v1370_v29  ;;  %v1377_v29 = vcombine.high %v495_v26, %v496_v27 }
  0x4d   : > { %587 = vmatprep.subr.bf16.mxu1 %v1373_v32  ;;  %v1393_v32 = vcombine.high %v642_v28, %v643_v30  ;;  %v1418_v28 = vcombine.low %v930_v20, %v931_v21  ;;  %v787_v30 = vld [vmem:[#allocation3 + $0x150] sm:$0xff] }
  0x50   : > { %588 = vmatpush1.bf16.msra.mxu1 %v1372_v33  ;;  %v1376_v33 = vcombine.low %v495_v26, %v496_v27  ;;  %v933_v26 = vld [vmem:[#allocation3 + $0x138] sm:$0xff] }
  0x51   : > { %589 = vmatprep.subr.bf16.mxu1 %v1375_v36  ;;  %v644_v36 = vld [vmem:[#allocation3 + $0x1c8] sm:$0xff] }
  0x52   : > { %v1394_v42 = vcombine.low %v644_v36, %v645_v38 }
  0x54   : > { %590 = vmatpush1.bf16.msra.mxu1 %v1374_v37  ;;  %v1379_v37 = vcombine.high %v497_v34, %v498_v35 }
  0x55   : > { %591 = vmatprep.subr.bf16.mxu1 %v1377_v29 }
  0x58   : > { %592 = vmatpush1.bf16.msra.mxu1 %v1376_v33  ;;  %v935_v33 = vld [vmem:[#allocation3 + $0x178] sm:$0xff] }
  0x59   : > { %593 = vmatprep.subr.bf16.mxu1 %v1379_v37 }
  0xbd   : > { %v354_v43 = vpop.permute.xlu1 %353  ;;  %v339_v44 = vpop.permute.xlu0 %338 }
  0xbe   : > { %v364_v51 = vmul.f32 %v363_v46, %v354_v43  ;;  %v350_v52 = vmul.f32 %v349_v47, %v339_v44  ;;  %v1395_v43 = vcombine.high %v644_v36, %v645_v38  ;;  %v1378_v44 = vcombine.low %v497_v34, %v498_v35  ;;  %v789_v38 = vld [vmem:[#allocation3 + $0x190] sm:$0xff] }
  0xc0   : > { %v366_v57 = vadd.f32 %v364_v51, %v350_v52  ;;  %594 = vmatpush1.bf16.msra.mxu1 %v1378_v44  ;;  %v937_v44 = vld [vmem:[#allocation3 + $0x1b8] sm:$0xff] }
  0xc1   : > { %v358_v48 = vpop.permute.xlu1 %357  ;;  %v344_v49 = vpop.permute.xlu0 %343 }
  0xc2   : > { %v365_v53 = vmul.f32 %v363_v46, %v358_v48  ;;  %v351_v54 = vmul.f32 %v349_v47, %v344_v49  ;;  %v777_v46 = vld [vmem:[#allocation3 + $0x10] sm:$0xff]  ;;  %v924_v48 = vld [vmem:[#allocation3 + $0x18] sm:$0xff] }
  0xc3   : > { %v778_v47 = vld [vmem:[#allocation3 + $0x30] sm:$0xff] }
  0xc4   : > { %v367_v58 = vadd.f32 %v365_v53, %v351_v54  ;;  %v1397_v49 = vcombine.high %v777_v46, %v778_v47  ;;  %v1396_v51 = vcombine.low %v777_v46, %v778_v47  ;;  %v1358_v54 = vld [vmem:[%s1940_s4] ss:$0 sm:$0xff] }
  0xc6   : > { %v374_v55 = vpop.permute.xlu1 %373  ;;  %v370_v56 = vpop.permute.xlu0 %369  ;;  %873 = vmatprep.subr.bf16.mxu1 %v1397_v49 }
  0xc7   : > { %v381_v59 = vmul.f32 %v379_v50, %v374_v55  ;;  %v380_v60 = vmul.f32 %v379_v50, %v370_v56  ;;  %v925_v50 = vld [vmem:[#allocation3 + $0x38] sm:$0xff] }
  0xc8   : > { %v1412_v52 = vcombine.low %v924_v48, %v925_v50  ;;  %v1413_v53 = vcombine.high %v924_v48, %v925_v50  ;;  %v791_v50 = vld [vmem:[#allocation3 + $0x1d0] sm:$0xff] }
  0xc9   : > { %v383_v62 = vadd.f32 %v381_v59, %v367_v58  ;;  %v382_v63 = vadd.f32 %v380_v60, %v366_v57 }
  0xcb   : > { %v392_v0 = vadd.f32 %v1357_v61, %v383_v62  ;;  %v391_v2 = vadd.f32 %v1357_v61, %v382_v63  ;;  %v779_v61 = vld [vmem:[#allocation3 + $0x50] sm:$0xff]  ;;  %v926_v63 = vld [vmem:[#allocation3 + $0x58] sm:$0xff] }
  0xcc   : > { %v780_v62 = vld [vmem:[#allocation3 + $0x70] sm:$0xff] }
  0xcd   : > { %v394_v5 = vmax.f32 %v392_v0, 0.0  ;;  %v393_v6 = vmax.f32 %v391_v2, 0.0  ;;  %v927_v0 = vld [vmem:[#allocation3 + $0x78] sm:$0xff] }
  0xcf   : > { %v395_v7 = vpack.c.bf16 %v394_v5, %v393_v6  ;;  %v1399_v5 = vcombine.high %v779_v61, %v780_v62  ;;  %v1415_v6 = vcombine.high %v926_v63, %v927_v0 }
  0xd1   : > { %1449 = vmatmul.mubr.msk.bf16.vlgmr.msra.gmra.mrb[0].mxu0 %vm435_vm1, %v395_v7  ;;  %v781_v7 = vld [vmem:[#allocation3 + $0x90] sm:$0xff] }
  0xd2   : > { %727 = vmatpush1.bf16.msra.mxu0 %v1380_v18  ;;  %758 = vmatprep.mubr.bf16.mxu0 %v1650_v1  ;;  %v1391_v18 = vcombine.high %v640_v24, %v641_v12  ;;  %v1419_v12 = vcombine.high %v930_v20, %v931_v21 }
  0xd3   : > { %728 = vmatprep.subr.bf16.mxu0 %v1383_v8  ;;  %v782_v8 = vld [vmem:[#allocation3 + $0xb0] sm:$0xff] }
  0xd4   : > { %v1401_v15 = vcombine.high %v781_v7, %v782_v8 }
  0xd6   : > { %729 = vmatpush1.bf16.msra.mxu0 %v1382_v11  ;;  %v1398_v11 = vcombine.low %v779_v61, %v780_v62 }
  0xd7   : > { %730 = vmatprep.subr.bf16.mxu0 %v1385_v13  ;;  %v1414_v13 = vcombine.low %v926_v63, %v927_v0 }
  0xda   : > { %731 = vmatpush1.bf16.msra.mxu0 %v1384_v17  ;;  %v783_v17 = vld [vmem:[#allocation3 + $0xd0] sm:$0xff] }
  0xdb   : > { %732 = vmatprep.subr.bf16.mxu0 %v1387_v19  ;;  %v784_v19 = vld [vmem:[#allocation3 + $0xf0] sm:$0xff] }
  0xdc   : > { %v1403_v24 = vcombine.high %v783_v17, %v784_v19  ;;  %v1402_v27 = vcombine.low %v783_v17, %v784_v19 }
  0xde   : > { %733 = vmatpush1.bf16.msra.mxu0 %v1386_v22  ;;  %v1400_v22 = vcombine.low %v781_v7, %v782_v8 }
  0xdf   : > { %734 = vmatprep.subr.bf16.mxu0 %v1389_v23  ;;  %v1416_v23 = vcombine.low %v928_v9, %v929_v10 }
  0xe2   : > { %735 = vmatpush1.bf16.msra.mxu0 %v1388_v14  ;;  %v785_v14 = vld [vmem:[#allocation3 + $0x110] sm:$0xff] }
  0xe3   : > { %736 = vmatprep.subr.bf16.mxu0 %v1391_v18  ;;  %v786_v18 = vld [vmem:[#allocation3 + $0x130] sm:$0xff] }
  0xe4   : > { %v1405_v29 = vcombine.high %v785_v14, %v786_v18  ;;  %v1404_v34 = vcombine.low %v785_v14, %v786_v18 }
  0xe6   : > { %737 = vmatpush1.bf16.msra.mxu0 %v1390_v25  ;;  %v932_v25 = vld [vmem:[#allocation3 + $0x118] sm:$0xff] }
  0xe7   : > { %738 = vmatprep.subr.bf16.mxu0 %v1393_v32  ;;  %v934_v32 = vld [vmem:[#allocation3 + $0x158] sm:$0xff]  ;;  %v1420_v35 = vcombine.low %v932_v25, %v933_v26 }
  0xe8   : > { %v1423_v37 = vcombine.high %v934_v32, %v935_v33  ;;  %v1422_v47 = vcombine.low %v934_v32, %v935_v33 }
  0xea   : > { %739 = vmatpush1.bf16.msra.mxu0 %v1392_v31  ;;  %v788_v31 = vld [vmem:[#allocation3 + $0x170] sm:$0xff] }
  0xeb   : > { %740 = vmatprep.subr.bf16.mxu0 %v1395_v43  ;;  %v1407_v36 = vcombine.high %v787_v30, %v788_v31  ;;  %v936_v43 = vld [vmem:[#allocation3 + $0x198] sm:$0xff]  ;;  %v1406_v46 = vcombine.low %v787_v30, %v788_v31 }
  0xec   : > { %v1425_v49 = vcombine.high %v936_v43, %v937_v44 }
  0xee   : > { %741 = vmatpush1.bf16.msra.mxu0 %v1394_v42  ;;  %v790_v42 = vld [vmem:[#allocation3 + $0x1b0] sm:$0xff] }
  0xef   : > { %1020 = vmatprep.subr.bf16.mxu0 %v1413_v53  ;;  %v1409_v48 = vcombine.high %v789_v38, %v790_v42  ;;  %v939_v53 = vld [vmem:[#allocation3 + $0x1f8] sm:$0xff] }
 0x1a4   : > { %v473_v55 = vpop.f32.mrb[0].mxu0 }
 0x1a5   : > { %v474_v56 = vadd.f32 %v1358_v54, %v473_v55  ;;  %v1450_v57 = vpop.f32.mrb[1].mxu0  ;;  %v1424_v55 = vcombine.low %v936_v43, %v937_v44 }
 0x1a6   : > { %v476_v58 = vpop.f32.mrb[2].mxu0 }
 0x1a7   : > { %v477_v59 = vadd.f32 %v1358_v54, %v476_v58  ;;  %v1451_v60 = vpop.f32.mrb[3].mxu0  ;;  %v480_v2 = vmax.f32 %v474_v56, 0.0  ;;  %v1408_v54 = vcombine.low %v789_v38, %v790_v42 }
 0x1a9   : > { %v481_v3 = vmax.f32 %v477_v59, 0.0 }
 0x1ab   : > { %v1840_v4 = vpack.c.bf16 %v481_v3, %v480_v2 }
 0x1ad   : > { %612 = vmatmul.mubr.bf16.vlgmr.msra.gmra.mrb[0].mxu1 %v1840_v4  ;;  %759 = vmatmul.mubr.bf16.vlgmr.msra.gmra.mrb[4].mxu0 %v1840_v4 }
 0x1ae   : > { %874 = vmatpush1.bf16.msra.mxu1 %v1396_v51  ;;  %1021 = vmatpush1.bf16.msra.mxu0 %v1412_v52  ;;  %v792_v51 = vld [vmem:[#allocation3 + $0x1f0] sm:$0xff]  ;;  %v938_v52 = vld [vmem:[#allocation3 + $0x1d8] sm:$0xff] }
 0x1af   : > { %875 = vmatprep.subr.bf16.mxu1 %v1399_v5  ;;  %1022 = vmatprep.subr.bf16.mxu0 %v1415_v6  ;;  %v1411_v56 = vcombine.high %v791_v50, %v792_v51  ;;  %v1427_v57 = vcombine.high %v938_v52, %v939_v53  ;;  %v1410_v58 = vcombine.low %v791_v50, %v792_v51 }
 0x1b0   : > { %905 = vmatprep.mubr.bf16.mxu1 %v1650_v1  ;;  %1052 = vmatprep.mubr.bf16.mxu0 %v1650_v1  ;;  %v1421_v1 = vcombine.high %v932_v25, %v933_v26  ;;  %v1426_v59 = vcombine.low %v938_v52, %v939_v53  ;;  %v1654_v26 = vmov 1966171168  }
 0x1b2   : > { %876 = vmatpush1.bf16.msra.mxu1 %v1398_v11  ;;  %1023 = vmatpush1.bf16.msra.mxu0 %v1414_v13 }
 0x1b3   : > { %877 = vmatprep.subr.bf16.mxu1 %v1401_v15  ;;  %1024 = vmatprep.subr.bf16.mxu0 %v1417_v16 }
 0x1b6   : > { %878 = vmatpush1.bf16.msra.mxu1 %v1400_v22  ;;  %1025 = vmatpush1.bf16.msra.mxu0 %v1416_v23  ;;  %v1851_v22 = vld [vmem:[%s1942_s6] sm:$0xff] }
 0x1b7   : > { %879 = vmatprep.subr.bf16.mxu1 %v1403_v24  ;;  %1026 = vmatprep.subr.bf16.mxu0 %v1419_v12  ;;  %v1146_v12 = vsub.s32 3, %v1816_v39  ;;  %v1139_v32 = vrot.slane %v1851_v22, %v362_v40 }
 0x1ba   : > { %880 = vmatpush1.bf16.msra.mxu1 %v1402_v27  ;;  %1027 = vmatpush1.bf16.msra.mxu0 %v1418_v28  ;;  %v1201_v27 = vunpack.c.l.s4 %v1654_v26 }
 0x1bb   : > { %881 = vmatprep.subr.bf16.mxu1 %v1405_v29  ;;  %1028 = vmatprep.subr.bf16.mxu0 %v1421_v1  ;;  %v1135_v29 = vrot.slane %v1851_v22, %v348_v41  ;;  %v1143_v1 = vrot.slane %v1851_v22, %v378_v45 }
 0x1bc   : > { %v1202_v42 = vunpack.c.0.s8 %v1201_v27 }
 0x1be   : > { %882 = vmatpush1.bf16.msra.mxu1 %v1404_v34  ;;  %1029 = vmatpush1.bf16.msra.mxu0 %v1420_v35  ;;  %v1147_v35 = vrot.slane %v1851_v22, %v1146_v12  ;;  %v1865_v50 = vsub.s32 %v1202_v42, %v1816_v39 }
 0x1bf   : > { %883 = vmatprep.subr.bf16.mxu1 %v1407_v36  ;;  %1030 = vmatprep.subr.bf16.mxu0 %v1423_v37 }
 0x1c2   : > { %884 = vmatpush1.bf16.msra.mxu1 %v1406_v46  ;;  %1031 = vmatpush1.bf16.msra.mxu0 %v1422_v47 }
 0x1c3   : > { %885 = vmatprep.subr.bf16.mxu1 %v1409_v48  ;;  %1032 = vmatprep.subr.bf16.mxu0 %v1425_v49 }
 0x1c6   : > { %886 = vmatpush1.bf16.msra.mxu1 %v1408_v54  ;;  %1033 = vmatpush1.bf16.msra.mxu0 %v1424_v55 }
 0x1c7   : > { %887 = vmatprep.subr.bf16.mxu1 %v1411_v56  ;;  %1034 = vmatprep.subr.bf16.mxu0 %v1427_v57 }
 0x1ca   : > { %888 = vmatpush1.bf16.msra.mxu1 %v1410_v58  ;;  %1035 = vmatpush1.bf16.msra.mxu0 %v1426_v59 }
 0x1cd   : > { %906 = vmatmul.mubr.bf16.vlgmr.msra.gmra.mrb[4].mxu1 %v1840_v4  ;;  %1053 = vmatmul.mubr.bf16.vlgmr.msra.gmra.mrb[8].mxu0 %v1840_v4 }
 0x280   : > { %v613_v60 = vpop.f32.mrb[0].mxu1  ;;  %v760_v61 = vpop.f32.mrb[4].mxu0 }
 0x281   : > { %v615_v62 = vpop.f32.mrb[1].mxu1  ;;  %v762_v63 = vpop.f32.mrb[5].mxu0 }
 0x282   : > { %v617_v0 = vpop.f32.mrb[2].mxu1  ;;  %v764_v2 = vpop.f32.mrb[6].mxu0 }
 0x283   : > { %v622_v3 = vmax.f32 %v613_v60, %v617_v0  ;;  %v769_v5 = vmax.f32 %v760_v61, %v764_v2  ;;  %v619_v6 = vpop.f32.mrb[3].mxu1  ;;  %v766_v7 = vpop.f32.mrb[7].mxu0 }
 0x284   : > { %v623_v8 = vmax.f32 %v615_v62, %v619_v6  ;;  %v770_v9 = vmax.f32 %v762_v63, %v766_v7 }
 0x285   : > { %v1082_v10 = vrot.slane %v622_v3, 4  ;;  %v1094_v11 = vrot.slane %v769_v5, 4 }
 0x286   : > { %v1088_v13 = vrot.slane %v623_v8, 4  ;;  %v1100_v15 = vrot.slane %v770_v9, 4 }
 0x287   : > { %v1083_v16 = vmax.f32 %v622_v3, %v1082_v10  ;;  %v1095_v17 = vmax.f32 %v769_v5, %v1094_v11 }
 0x288   : > { %v1089_v19 = vmax.f32 %v623_v8, %v1088_v13  ;;  %v1101_v4 = vmax.f32 %v770_v9, %v1100_v15 }
 0x289   : > { %v1084_v20 = vrot.slane %v1083_v16, 2  ;;  %v1096_v21 = vrot.slane %v1095_v17, 2 }
 0x28a   : > { %v1090_v23 = vrot.slane %v1089_v19, 2  ;;  %v1102_v24 = vrot.slane %v1101_v4, 2 }
 0x28b   : > { %v1085_v14 = vmax.f32 %v1083_v16, %v1084_v20  ;;  %v1097_v18 = vmax.f32 %v1095_v17, %v1096_v21  ;;  %v1150_v17 = vsub.s32 4, %v1816_v39  ;;  %v1154_v21 = vsub.s32 5, %v1816_v39 }
 0x28c   : > { %v1091_v25 = vmax.f32 %v1089_v19, %v1090_v23  ;;  %v1103_v28 = vmax.f32 %v1101_v4, %v1102_v24  ;;  %v1158_v4 = vsub.s32 6, %v1816_v39  ;;  %v1162_v24 = vsub.s32 7, %v1816_v39 }
 0x28d   : > { %v1086_v30 = vrot.slane %v1085_v14, 1  ;;  %v1098_v31 = vrot.slane %v1097_v18, 1  ;;  %v1151_v27 = vrot.slane %v1851_v22, %v1150_v17 }
 0x28e   : > { %v1092_v33 = vrot.slane %v1091_v25, 1  ;;  %v1104_v34 = vrot.slane %v1103_v28, 1 }
 0x28f   : > { %v1087_v36 = vmax.f32 %v1085_v14, %v1086_v30  ;;  %v1099_v37 = vmax.f32 %v1097_v18, %v1098_v31  ;;  %v1155_v30 = vrot.slane %v1851_v22, %v1154_v21 }
 0x290   : > { %v1093_v38 = vmax.f32 %v1091_v25, %v1092_v33  ;;  %v1105_v43 = vmax.f32 %v1103_v28, %v1104_v34 }
 0x291   : > { %v1172_v41 = vadd.f32 %v1135_v29, %v1087_v36  ;;  %v1174_v44 = vadd.f32 %v1143_v1, %v1099_v37  ;;  %v1159_v29 = vrot.slane %v1851_v22, %v1158_v4 }
 0x292   : > { %v1173_v46 = vadd.f32 %v1139_v32, %v1093_v38  ;;  %v1175_v47 = vadd.f32 %v1147_v35, %v1105_v43  ;;  %v1163_v32 = vrot.slane %v1851_v22, %v1162_v24 }
 0x293   : > { %v1180_v45 = vmax.f32 %v1172_v41, 0.0  ;;  %v1182_v48 = vmax.f32 %v1174_v44, 0.0 }
 0x294   : > { %v1181_v49 = vmax.f32 %v1173_v46, 0.0  ;;  %v1183_v40 = vmax.f32 %v1175_v47, 0.0 }
 0x296   : > { %v1196_v51 = vcombine.low %v1180_v45, %v1181_v49  ;;  %v1197_v52 = vcombine.low %v1182_v48, %v1183_v40 }
 0x298   : > { %v1206_v53 = vrot.slane %v1196_v51, %v1865_v50  ;;  %v1213_v54 = vrot.slane %v1197_v52, %v1865_v50 }
 0x29a   : > { %v1869_v55 = vcombine.low %v1206_v53, %v1213_v54 }
 0x29c   : > { %v1236_v40 = vrot.slane %v1869_v55, %v1865_v50 }
 0x2a0   : > { %v907_v56 = vpop.f32.mrb[4].mxu1  ;;  %v1054_v57 = vpop.f32.mrb[8].mxu0 }
 0x2a1   : > { %v909_v58 = vpop.f32.mrb[5].mxu1  ;;  %v1056_v59 = vpop.f32.mrb[9].mxu0 }
 0x2a2   : > { %v911_v60 = vpop.f32.mrb[6].mxu1  ;;  %v1058_v61 = vpop.f32.mrb[10].mxu0 }
 0x2a3   : > { %v916_v62 = vmax.f32 %v907_v56, %v911_v60  ;;  %v1063_v63 = vmax.f32 %v1054_v57, %v1058_v61  ;;  %v913_v0 = vpop.f32.mrb[7].mxu1  ;;  %v1060_v2 = vpop.f32.mrb[11].mxu0 }
 0x2a4   : > { %v917_v3 = vmax.f32 %v909_v58, %v913_v0  ;;  %v1064_v5 = vmax.f32 %v1056_v59, %v1060_v2 }
 0x2a5   : > { %v1106_v6 = vrot.slane %v916_v62, 4  ;;  %v1118_v7 = vrot.slane %v1063_v63, 4 }
 0x2a6   : > { %v1112_v8 = vrot.slane %v917_v3, 4  ;;  %v1124_v9 = vrot.slane %v1064_v5, 4 }
 0x2a7   : > { %v1107_v10 = vmax.f32 %v916_v62, %v1106_v6  ;;  %v1119_v11 = vmax.f32 %v1063_v63, %v1118_v7 }
 0x2a8   : > { %v1113_v13 = vmax.f32 %v917_v3, %v1112_v8  ;;  %v1125_v15 = vmax.f32 %v1064_v5, %v1124_v9 }
 0x2a9   : > { %v1108_v16 = vrot.slane %v1107_v10, 2  ;;  %v1120_v19 = vrot.slane %v1119_v11, 2 }
 0x2aa   : > { %v1114_v20 = vrot.slane %v1113_v13, 2  ;;  %v1126_v23 = vrot.slane %v1125_v15, 2 }
 0x2ab   : > { %v1109_v12 = vmax.f32 %v1107_v10, %v1108_v16  ;;  %v1121_v14 = vmax.f32 %v1119_v11, %v1120_v19 }
 0x2ac   : > { %v1115_v18 = vmax.f32 %v1113_v13, %v1114_v20  ;;  %v1127_v25 = vmax.f32 %v1125_v15, %v1126_v23 }
 0x2ad   : > { %v1110_v26 = vrot.slane %v1109_v12, 1  ;;  %v1122_v28 = vrot.slane %v1121_v14, 1 }
 0x2ae   : > { %v1116_v1 = vrot.slane %v1115_v18, 1  ;;  %v1128_v31 = vrot.slane %v1127_v25, 1 }
 0x2af   : > { %v1111_v33 = vmax.f32 %v1109_v12, %v1110_v26  ;;  %v1123_v34 = vmax.f32 %v1121_v14, %v1122_v28 }
 0x2b0   : > { %v1117_v39 = vmax.f32 %v1115_v18, %v1116_v1  ;;  %v1129_v35 = vmax.f32 %v1127_v25, %v1128_v31 }
 0x2b1   : > { %v1176_v36 = vadd.f32 %v1151_v27, %v1111_v33  ;;  %v1178_v37 = vadd.f32 %v1159_v29, %v1123_v34 }
 0x2b2   : > { %v1177_v38 = vadd.f32 %v1155_v30, %v1117_v39  ;;  %v1179_v42 = vadd.f32 %v1163_v32, %v1129_v35 }
 0x2b3   : > { %v1184_v43 = vmax.f32 %v1176_v36, 0.0  ;;  %v1186_v41 = vmax.f32 %v1178_v37, 0.0 }
 0x2b4   : > { %v1185_v44 = vmax.f32 %v1177_v38, 0.0  ;;  %v1187_v46 = vmax.f32 %v1179_v42, 0.0 }
 0x2b6   : > { %v1198_v47 = vcombine.low %v1184_v43, %v1185_v44  ;;  %v1199_v45 = vcombine.low %v1186_v41, %v1187_v46 }
 0x2b8   : > { %v1220_v22 = vrot.slane %v1198_v47, %v1865_v50  ;;  %v1227_v48 = vrot.slane %v1199_v45, %v1865_v50 }
 0x2ba   : > { %v1229_v49 = vcombine.low %v1220_v22, %v1227_v48 }
 0x2bc   : > { %v1243_v51 = vrot.slane %v1229_v49, %v1865_v50 }
 0x2be   : > { %v1244_v52 = vcombine.low %v1236_v40, %v1243_v51 }
 0x2c0   : > { %1246 = vst [vmem:[%s309_s21] sm:$0xff] %v1244_v52 }
 0x2c1   : > { %1575 = shalt.err (!%p1572_p6)
}
 0x2c2   : > { %s1576_s10 = scalar_lea.hbm %s1889_s15, 128  ;;  %s1580_s20 = scalar_lea.hbm %s1943_s7, 256 }
 0x2c3   : > { %p1577_p7 = scmp.ne.s32.totalorder %s1889_s15, %s1576_s10  ;;  %p1581_p0 = scmp.lt.u32.totalorder %s1889_s15, %s1943_s7 }
 0x2c4   : > { %p1582_p2 = scmp.lt.u32.totalorder %s1580_s20, %s1576_s10  ;;  %p1584_p8 = scmp.lt.u32.totalorder %s1576_s10, %s1889_s15 }
 0x2c5   : > { %p1578_p9 = pnand %p1577_p7, %p1955_p10 }
 0x2c6   : > { %p1583_p4 = por %p1582_p2, %p1581_p0 }
 0x2c7   : > { %p1579_p12 = pneg %p1578_p9 }
 0x2c8   : > { %p1585_p11 = por %p1584_p8, %p1583_p4 }
 0x2ca   : > { %p1586_p13 = pnand %p1585_p11, %p1579_p12 }
 0x2cc   : > { %1589 = shalt.err (!%p1586_p13)
}
 0x2cd   : > { %1456 = dma.vmem_to_hbm [thread:$0]  (%p1955_p10), %s1891_s23, 128, %s1889_s15, %s1248_s27  }
 0x2ce PF: > { %p1468_p1 = scmp.ge.s32.totalorder %s1644_s29, 2  ;;  %s1274_s18 = sand.u32 1, %s1624_s24  }
 0x2cf   : > { %p1956_p3 = scmp.ne.s32.totalorder %s1949_s13, 0  ;;  %s1275_s22 = scalar_lea.sflag [#allocation5], %s1274_s18 }
 0x2d1   : > { %p1463_p5 = pnand %p1468_p1, %p1956_p3 }
 0x2d3   : > { %1619 = dma.done.wait (!%p1463_p5), %s1275_s22, 128  }
 0x2d4   : > { %1621 = vsyncadd (!%p1463_p5), %s1275_s22, 4294967168  ;;  %s21_s29 = sadd.s32 1, %s1644_s29   ;;  %s1957_s24 = smov %s1628_s25 }
 0x2d5   : > { %p18_p6 = scmp.ge.s32.totalorder %s21_s29, 4   ;;  %s1958_s25 = smov %s1632_s26 }
 0x2d6   : > { %s1959_s26 = smov %s1749_s14  ;;  %s1960_s27 = smov %s1640_s28 }
 0x2d7   : > { %s1961_s28 = smov %s1963_s9  ;;  %20 = sbr.rel (!%p18_p6) target bundleno = 5 (0x5), region = 96 }
 0x2de   :  { %1280 = vsyncpa [#allocation4], 1 }
 0x2df   :  { %1282 = vsyncpa [#allocation4 + $0x1], 1 }
 0x2e0   :  { %1283 = vsyncpa [#allocation5], 1 }
 0x2e1   :  { %1285 = vsyncpa [#allocation5 + $0x1], 1 }

</bundles_post_ra>
